<compile_context>
chip_gen: v7x
topology: tpu7x:2x2x1
jax: 0.10.0
libtpu: 0.0.40
codegen_flags: <defaults>
</compile_context>

<pallas_src>
import jax
import jax.numpy as jnp
from jax import lax
from jax.experimental import pallas as pl
from jax.experimental.pallas import tpu as pltpu

CH = 128           # hidden channels of the LinearOutputStack
OUT_CH = 1         # discriminator scalar output
SLOPE = 0.2        # LeakyReLU negative slope used by LinearOutputStack
DEFAULT_TB = 4096  # batch tile (multiple of 128); sweep 2048-4096 per chip


def _round_up(n, m):
    return (n + m - 1) // m * m


def _choose_tile(B, tb_max):
    """Batch-tile size (multiple of 128) and grid size, for B >= 128."""
    tb_max = max(128, (tb_max // 128) * 128)
    tb_cover = _round_up(B, 128)
    if tb_cover <= tb_max:
        # Whole batch fits in one max-size tile; split into >=2 tiles when that still gives
        # full 128-row tiles so the "parallel" axis can use both v7x TensorCores.
        tb = tb_cover if tb_cover < 2 * 128 else _round_up(pl.cdiv(B, 2), 128)
    else:
        tb = tb_max
    return tb, pl.cdiv(B, tb)


def discriminator_kernel(x_ref,
                         w1_ref, b1_ref,
                         w2_ref, b2_ref,
                         w3_ref, b3_ref,
                         w4_ref,
                         o_ref):
    """One (TB, 128) batch tile: 3x (bf16 MXU matmul + f32 bias + bf16 LeakyReLU) + output layer."""
    h = x_ref[...].astype(jnp.bfloat16)                                # (TB, 128) bf16 (no-op if fed bf16)
    for w_ref, b_ref in ((w1_ref, b1_ref), (w2_ref, b2_ref), (w3_ref, b3_ref)):
        a = jnp.dot(h, w_ref[...], preferred_element_type=jnp.float32) + b_ref[...]   # f32 acc + bias
        a = a.astype(jnp.bfloat16)                                      # pack before the epilogue
        h = jnp.maximum(a, SLOPE * a)                                   # LeakyReLU(0.2): mul+max, bf16

    # Output layer Linear(128 -> 1) as (8,128) @ (TB,128)^T -> (8, TB): the per-row result
    # lands lane-dense (batch along lanes). Row 0 is the real weight row; rows 1..7 are the
    # zero padding added in the wrapper for layout friendliness.
    y = lax.dot_general(w4_ref[...], h, (((1,), (1,)), ((), ())),
                        preferred_element_type=jnp.float32)             # (8, TB) f32
    o_ref[...] = y[0:1, :]                                              # (1, TB) lane-dense store


def discriminator_forward(x, params, *, tb=DEFAULT_TB):
    """x: (B, 128) float32 or bfloat16; params: dict of weights/biases. Returns (B, 1) float32."""
    assert x.ndim == 2 and x.shape[1] == CH
    B = x.shape[0]
    assert B >= 1

    x_in = x
    if B < 128:
        # Tiny batch: one sub-128-row tile. Pad to a sublane multiple (<=128 rows, negligible
        # copy) so every block dim either divides (8,128) or equals the full array dim.
        TB = _round_up(B, 8)
        if TB != B:
            x_in = jnp.pad(x, ((0, TB - B), (0, 0)))
        num_tiles = 1
        out_cols = TB
    else:
        # Large batch: lane-dense tiles of TB rows. The (possibly) ragged tail uses Pallas
        # partial-block semantics instead of a full-array jnp.pad copy of x in HBM.
        TB, num_tiles = _choose_tile(B, tb)
        out_cols = B

    # Hidden-layer weights in bf16 for the MXU (cast once here; in deployment store them bf16).
    # Biases stay f32 for the f32-accumulated adds.
    w1 = params["w1"].astype(jnp.bfloat16)
    w2 = params["w2"].astype(jnp.bfloat16)
    w3 = params["w3"].astype(jnp.bfloat16)
    # Final-layer weight (torch layout (1,128)) padded to an (8,128) row block (tiny, one-off).
    w4 = jnp.pad(params["w4"].astype(jnp.bfloat16), ((0, 7), (0, 0)))

    # Grid-invariant spec: same block every iteration -> Pallas keeps it resident (no re-DMA).
    rep = lambda shape: pl.BlockSpec(shape, lambda i: (0,) * len(shape))

    out = pl.pallas_call(
        discriminator_kernel,
        out_shape=jax.ShapeDtypeStruct((1, out_cols), jnp.float32),      # lane-dense output slab
        grid=(num_tiles,),
        in_specs=[
            pl.BlockSpec((TB, CH), lambda i: (i, 0)),                    # x: batch-tiled, pipelined
            rep((CH, CH)), rep((1, CH)),                                 # W1, b1 (resident)
            rep((CH, CH)), rep((1, CH)),                                 # W2, b2
            rep((CH, CH)), rep((1, CH)),                                 # W3, b3
            rep((8, CH)),                                                # W4 (padded rows)
        ],
        out_specs=pl.BlockSpec((1, TB), lambda i: (0, i)),
        compiler_params=pltpu.CompilerParams(
            dimension_semantics=("parallel",),                           # shard tiles over v7x's 2 TCs
            vmem_limit_bytes=32 * 1024 * 1024),                          # headroom for TB sweeps
    )(x_in, w1, params["b1"], w2, params["b2"], w3, params["b3"], w4)

    # Restore the (B, 1) column layout and fold the scalar output bias here
    # (cheaper than shipping a (1,1) tile through the vector path).
    return out[0, :B].reshape(B, OUT_CH) + params["b4"]


def init_params(key):
    """Deterministic init mimicking make_initializer(0.1): uniform(-0.1, 0.1).

    w1..w3 are stored as (in, out) so the kernel does plain h @ W (== torch x @ W.T);
    w4 is kept in torch layout (out=1, in=128); biases are row vectors.
    """
    ks = jax.random.split(key, 8)
    u = lambda k, shape: jax.random.uniform(k, shape, jnp.float32, -0.1, 0.1)
    return {
        "w1": u(ks[0], (CH, CH)), "b1": u(ks[1], (1, CH)),
        "w2": u(ks[2], (CH, CH)), "b2": u(ks[3], (1, CH)),
        "w3": u(ks[4], (CH, CH)), "b3": u(ks[5], (1, CH)),
        "w4": u(ks[6], (OUT_CH, CH)), "b4": u(ks[7], (1, OUT_CH)),
    }


def _reference_forward(x, p):
    """Pure-JAX reference with the same bf16/f32 mixed precision as the kernel."""
    h = x.astype(jnp.bfloat16)
    for i in (1, 2, 3):
        a = jnp.dot(h, p[f"w{i}"].astype(jnp.bfloat16),
                    preferred_element_type=jnp.float32) + p[f"b{i}"]
        a = a.astype(jnp.bfloat16)
        h = jnp.maximum(a, SLOPE * a)
    y = jnp.dot(h, p["w4"].astype(jnp.bfloat16).T, preferred_element_type=jnp.float32)
    return y + p["b4"]


if __name__ == "__main__":
    key = jax.random.PRNGKey(0)
    k_params, k_x = jax.random.split(key)
    params = init_params(k_params)

    # (batch, input dtype, tile cap):
    #   - tiny batch -> single sub-128 tile (padded small path)
    #   - 256 rows, bf16 input -> 2 full tiles (recommended bf16 HBM stream, v7x 2-TC split)
    #   - 260 rows, tb=128 -> 3 tiles with a ragged 4-row tail handled without jnp.pad of x
    checks = [
        (4,   jnp.float32,  DEFAULT_TB),
        (256, jnp.bfloat16, DEFAULT_TB),
        (260, jnp.bfloat16, 128),
    ]
    for B, dtype, tb in checks:
        kx = jax.random.fold_in(k_x, B)
        x = jax.random.normal(kx, (B, CH), dtype)

        y = jax.block_until_ready(discriminator_forward(x, params, tb=tb))
        y_ref = _reference_forward(x, params)

        assert y.shape == (B, OUT_CH), f"bad output shape at B={B}: {y.shape}"
        assert jnp.allclose(y, y_ref, atol=1e-2, rtol=1e-2), f"mismatch vs reference at B={B}"

    print("KERNEL_OK")
</pallas_src>

<mosaic_0001>
module attributes {stable_mosaic.version = 11 : i64} {
  func.func @discriminator_kernel(%arg0: i32, %arg1: memref<8x128xf32, #tpu.memory_space<vmem>>, %arg2: memref<128x128xbf16, #tpu.memory_space<vmem>>, %arg3: memref<1x128xf32, #tpu.memory_space<vmem>>, %arg4: memref<128x128xbf16, #tpu.memory_space<vmem>>, %arg5: memref<1x128xf32, #tpu.memory_space<vmem>>, %arg6: memref<128x128xbf16, #tpu.memory_space<vmem>>, %arg7: memref<1x128xf32, #tpu.memory_space<vmem>>, %arg8: memref<8x128xbf16, #tpu.memory_space<vmem>>, %arg9: memref<1x8xf32, #tpu.memory_space<vmem>>) attributes {dimension_semantics = [#tpu.dimension_semantics<parallel>], iteration_bounds = array<i64: 1>, scalar_prefetch = 0 : i64, scratch_operands = 0 : i64, tpu.core_type = #tpu.core_type<tc>, window_params = [{transform_indices = @transform_0, window_bounds = array<i64: 8, 128>}, {pipeline_mode = #tpu.pipeline_mode<synchronous>, transform_indices = @transform_1, window_bounds = array<i64: 128, 128>}, {pipeline_mode = #tpu.pipeline_mode<synchronous>, transform_indices = @transform_2, window_bounds = array<i64: 1, 128>}, {pipeline_mode = #tpu.pipeline_mode<synchronous>, transform_indices = @transform_3, window_bounds = array<i64: 128, 128>}, {pipeline_mode = #tpu.pipeline_mode<synchronous>, transform_indices = @transform_4, window_bounds = array<i64: 1, 128>}, {pipeline_mode = #tpu.pipeline_mode<synchronous>, transform_indices = @transform_5, window_bounds = array<i64: 128, 128>}, {pipeline_mode = #tpu.pipeline_mode<synchronous>, transform_indices = @transform_6, window_bounds = array<i64: 1, 128>}, {pipeline_mode = #tpu.pipeline_mode<synchronous>, transform_indices = @transform_7, window_bounds = array<i64: 8, 128>}, {transform_indices = @transform_8, window_bounds = array<i64: 1, 8>}]} {
    %c0 = arith.constant 0 : index
    %c0_0 = arith.constant 0 : index
    %0 = vector.load %arg1[%c0, %c0_0] : memref<8x128xf32, #tpu.memory_space<vmem>>, vector<8x128xf32>
    %1 = arith.truncf %0 : vector<8x128xf32> to vector<8x128xbf16>
    %c0_1 = arith.constant 0 : index
    %c0_2 = arith.constant 0 : index
    %2 = vector.load %arg2[%c0_1, %c0_2] : memref<128x128xbf16, #tpu.memory_space<vmem>>, vector<128x128xbf16>
    %cst = arith.constant dense<0.000000e+00> : vector<8x128xf32>
    %3 = tpu.matmul %1, %2, %cst {dimension_numbers = #tpu.dot_dimension_numbers<[1], [0], [0], [1], [0, 0, 1, 1], [], []>} : vector<8x128xbf16>, vector<128x128xbf16>, vector<8x128xf32> -> vector<8x128xf32>
    %c0_3 = arith.constant 0 : index
    %c0_4 = arith.constant 0 : index
    %4 = vector.load %arg3[%c0_3, %c0_4] : memref<1x128xf32, #tpu.memory_space<vmem>>, vector<1x128xf32>
    %5 = vector.broadcast %4 : vector<1x128xf32> to vector<8x128xf32>
    %6 = arith.addf %3, %5 : vector<8x128xf32>
    %7 = arith.truncf %6 : vector<8x128xf32> to vector<8x128xbf16>
    %cst_5 = arith.constant 2.001950e-01 : bf16
    %8 = vector.broadcast %cst_5 : bf16 to vector<8x128xbf16>
    %9 = arith.mulf %8, %7 : vector<8x128xbf16>
    %10 = arith.maximumf %7, %9 : vector<8x128xbf16>
    %c0_6 = arith.constant 0 : index
    %c0_7 = arith.constant 0 : index
    %11 = vector.load %arg4[%c0_6, %c0_7] : memref<128x128xbf16, #tpu.memory_space<vmem>>, vector<128x128xbf16>
    %cst_8 = arith.constant dense<0.000000e+00> : vector<8x128xf32>
    %12 = tpu.matmul %10, %11, %cst_8 {dimension_numbers = #tpu.dot_dimension_numbers<[1], [0], [0], [1], [0, 0, 1, 1], [], []>} : vector<8x128xbf16>, vector<128x128xbf16>, vector<8x128xf32> -> vector<8x128xf32>
    %c0_9 = arith.constant 0 : index
    %c0_10 = arith.constant 0 : index
    %13 = vector.load %arg5[%c0_9, %c0_10] : memref<1x128xf32, #tpu.memory_space<vmem>>, vector<1x128xf32>
    %14 = vector.broadcast %13 : vector<1x128xf32> to vector<8x128xf32>
    %15 = arith.addf %12, %14 : vector<8x128xf32>
    %16 = arith.truncf %15 : vector<8x128xf32> to vector<8x128xbf16>
    %cst_11 = arith.constant 2.001950e-01 : bf16
    %17 = vector.broadcast %cst_11 : bf16 to vector<8x128xbf16>
    %18 = arith.mulf %17, %16 : vector<8x128xbf16>
    %19 = arith.maximumf %16, %18 : vector<8x128xbf16>
    %c0_12 = arith.constant 0 : index
    %c0_13 = arith.constant 0 : index
    %20 = vector.load %arg6[%c0_12, %c0_13] : memref<128x128xbf16, #tpu.memory_space<vmem>>, vector<128x128xbf16>
    %cst_14 = arith.constant dense<0.000000e+00> : vector<8x128xf32>
    %21 = tpu.matmul %19, %20, %cst_14 {dimension_numbers = #tpu.dot_dimension_numbers<[1], [0], [0], [1], [0, 0, 1, 1], [], []>} : vector<8x128xbf16>, vector<128x128xbf16>, vector<8x128xf32> -> vector<8x128xf32>
    %c0_15 = arith.constant 0 : index
    %c0_16 = arith.constant 0 : index
    %22 = vector.load %arg7[%c0_15, %c0_16] : memref<1x128xf32, #tpu.memory_space<vmem>>, vector<1x128xf32>
    %23 = vector.broadcast %22 : vector<1x128xf32> to vector<8x128xf32>
    %24 = arith.addf %21, %23 : vector<8x128xf32>
    %25 = arith.truncf %24 : vector<8x128xf32> to vector<8x128xbf16>
    %cst_17 = arith.constant 2.001950e-01 : bf16
    %26 = vector.broadcast %cst_17 : bf16 to vector<8x128xbf16>
    %27 = arith.mulf %26, %25 : vector<8x128xbf16>
    %28 = arith.maximumf %25, %27 : vector<8x128xbf16>
    %c0_18 = arith.constant 0 : index
    %c0_19 = arith.constant 0 : index
    %29 = vector.load %arg8[%c0_18, %c0_19] : memref<8x128xbf16, #tpu.memory_space<vmem>>, vector<8x128xbf16>
    %cst_20 = arith.constant dense<0.000000e+00> : vector<8x8xf32>
    %30 = tpu.matmul %29, %28, %cst_20 {dimension_numbers = #tpu.dot_dimension_numbers<[1], [1], [0], [0], [0, 0, 1, 0], [], []>} : vector<8x128xbf16>, vector<8x128xbf16>, vector<8x8xf32> -> vector<8x8xf32>
    %31 = vector.extract_strided_slice %30 {offsets = [0, 0], sizes = [1, 8], strides = [1, 1]} : vector<8x8xf32> to vector<1x8xf32>
    %c0_21 = arith.constant 0 : index
    %c0_22 = arith.constant 0 : index
    %32 = vector.load %arg9[%c0_21, %c0_22] : memref<1x8xf32, #tpu.memory_space<vmem>>, vector<1x8xf32>
    tpu.vector_store %arg9[%c0_21, %c0_22], %31 {strides = array<i32>} : memref<1x8xf32, #tpu.memory_space<vmem>>, vector<1x8xf32>,
    return
  }
  func.func @transform_0(%arg0: i32) -> (i32, i32) {
    %c0_i32 = arith.constant 0 : i32
    %c0_i32_0 = arith.constant 0 : i32
    return %arg0, %c0_i32 : i32, i32
  }
  func.func @transform_1(%arg0: i32) -> (i32, i32) {
    %c0_i32 = arith.constant 0 : i32
    %c0_i32_0 = arith.constant 0 : i32
    %c0_i32_1 = arith.constant 0 : i32
    return %c0_i32, %c0_i32_0 : i32, i32
  }
  func.func @transform_2(%arg0: i32) -> (i32, i32) {
    %c0_i32 = arith.constant 0 : i32
    %c0_i32_0 = arith.constant 0 : i32
    %c0_i32_1 = arith.constant 0 : i32
    return %c0_i32, %c0_i32_0 : i32, i32
  }
  func.func @transform_3(%arg0: i32) -> (i32, i32) {
    %c0_i32 = arith.constant 0 : i32
    %c0_i32_0 = arith.constant 0 : i32
    %c0_i32_1 = arith.constant 0 : i32
    return %c0_i32, %c0_i32_0 : i32, i32
  }
  func.func @transform_4(%arg0: i32) -> (i32, i32) {
    %c0_i32 = arith.constant 0 : i32
    %c0_i32_0 = arith.constant 0 : i32
    %c0_i32_1 = arith.constant 0 : i32
    return %c0_i32, %c0_i32_0 : i32, i32
  }
  func.func @transform_5(%arg0: i32) -> (i32, i32) {
    %c0_i32 = arith.constant 0 : i32
    %c0_i32_0 = arith.constant 0 : i32
    %c0_i32_1 = arith.constant 0 : i32
    return %c0_i32, %c0_i32_0 : i32, i32
  }
  func.func @transform_6(%arg0: i32) -> (i32, i32) {
    %c0_i32 = arith.constant 0 : i32
    %c0_i32_0 = arith.constant 0 : i32
    %c0_i32_1 = arith.constant 0 : i32
    return %c0_i32, %c0_i32_0 : i32, i32
  }
  func.func @transform_7(%arg0: i32) -> (i32, i32) {
    %c0_i32 = arith.constant 0 : i32
    %c0_i32_0 = arith.constant 0 : i32
    %c0_i32_1 = arith.constant 0 : i32
    return %c0_i32, %c0_i32_0 : i32, i32
  }
  func.func @transform_8(%arg0: i32) -> (i32, i32) {
    %c0_i32 = arith.constant 0 : i32
    %c0_i32_0 = arith.constant 0 : i32
    return %c0_i32, %arg0 : i32, i32
  }
}

</mosaic_0001>

<bundles_post_ra>
// kernel: tpu_custom_call.1
= control target key start
LH: loop header
LB: loop body
LE: loop exit
PB: predicated region body
PF: predicated region fallthrough
CT: control target
= control target key end

     0   :  { %13 = vsyncpa [#allocation3], 0  ;;  %s930_s0 = inlined_call_operand.hbm [shape: f32[8,128], index: 0, kind: input, shape index: {}]   ;;  %s931_s1 = inlined_call_operand.hbm [shape: bf16[128,128], index: 1, kind: input, shape index: {}]   ;;  %s932_s2 = inlined_call_operand.vmem [shape: f32[1,128], index: 2, kind: input, shape index: {}]   ;;  %s933_s3 = inlined_call_operand.hbm [shape: bf16[128,128], index: 3, kind: input, shape index: {}]   ;;  %s934_s4 = inlined_call_operand.vmem [shape: f32[1,128], index: 4, kind: input, shape index: {}]   ;;  %s935_s5 = inlined_call_operand.hbm [shape: bf16[128,128], index: 5, kind: input, shape index: {}]   ;;  %s936_s6 = inlined_call_operand.vmem [shape: f32[1,128], index: 6, kind: input, shape index: {}]   ;;  %s937_s7 = inlined_call_operand.vmem [shape: bf16[8,128], index: 7, kind: input, shape index: {}]   ;;  %s938_s8 = inlined_call_operand.hbm [shape: f32[1,8], index: 8, kind: output, shape index: {}]  }
   0x1   :  { %14 = vsyncpa [#allocation6], 0 }
   0x2   :  { %15 = vsyncpa [#allocation9], 0 }
   0x3   :  { %16 = vsyncpa [#allocation4], 0  ;;  %s762_s27 = smov [#allocation5]   ;;  %s644_s9 = scalar_lea.hbm %s931_s1, 1024 }
   0x4   :  { %s32_s28 = sshll.u32 %s762_s27, 4  ;;  %p645_p0 = scmp.ne.s32.totalorder %s931_s1, %s644_s9  ;;  %s33_s28 = int_to_ptr.vmem [resolvable:$true] %s32_s28 }
   0x5   :  { %p648_p1 = scmp.lt.u32.totalorder %s644_s9, %s931_s1 }
   0x7   :  { %p650_p2 = pnand %p648_p1, %p645_p0 }
   0x9   :  { %653 = shalt.err (!%p650_p2)
}
   0xa   :  { %s654_s14 = scalar_lea.vmem %s33_s28, 1024  ;;  %p659_p4 = scmp.lt.s32.totalorder %s33_s28, %s33_s28 }
   0xb   :  { %p655_p3 = scmp.ne.s32.totalorder %s33_s28, %s654_s14  ;;  %p660_p5 = scmp.lt.s32.totalorder %s654_s14, %s654_s14 }
   0xd   :  { %p661_p6 = por %p660_p5, %p659_p4 }
   0xf   :  { %p662_p7 = pnand %p661_p6, %p655_p3 }
  0x11   :  { %665 = shalt.err (!%p662_p7)
}
  0x12   :  { %s763_s15 = smov 64   ;;  %s764_s16 = smov 4  }
  0x13   :  { %38 = dma.hbm_to_vmem [thread:$0]  %s931_s1, 1024, %s33_s28, [#allocation6], %s763_s15, %s763_s15, %s764_s16  }
  0x14   :  { %s765_s19 = smov [#allocation2]   ;;  %s766_s21 = smov [#allocation7]  }
  0x15   :  { %s23_s20 = sshll.u32 %s765_s19, 4  ;;  %s46_s22 = sshll.u32 %s766_s21, 4  ;;  %s24_s20 = int_to_ptr.vmem [resolvable:$true] %s23_s20  ;;  %s47_s22 = int_to_ptr.vmem [resolvable:$true] %s46_s22 }
  0x16   :  { %s666_s25 = scalar_lea.hbm %s930_s0, 128 }
  0x17   :  { %p667_p8 = scmp.ne.s32.totalorder %s930_s0, %s666_s25  ;;  %p670_p9 = scmp.lt.u32.totalorder %s666_s25, %s930_s0 }
  0x19   :  { %p672_p10 = pnand %p670_p9, %p667_p8 }
  0x1b   :  { %675 = shalt.err (!%p672_p10)
}
  0x1c   :  { %s676_s1 = scalar_lea.vmem %s24_s20, 128  ;;  %p681_p12 = scmp.lt.s32.totalorder %s24_s20, %s24_s20 }
  0x1d   :  { %p677_p11 = scmp.ne.s32.totalorder %s24_s20, %s676_s1  ;;  %p682_p13 = scmp.lt.s32.totalorder %s676_s1, %s676_s1 }
  0x1f   :  { %p683_p0 = por %p682_p13, %p681_p12 }
  0x21   :  { %p684_p1 = pnand %p683_p0, %p677_p11 }
  0x23   :  { %687 = shalt.err (!%p684_p1)
}
  0x24   :  { %26 = dma.hbm_to_vmem [thread:$0]  %s930_s0, 128, %s24_s20, [#allocation3]  }
  0x25   :  { %s688_s12 = scalar_lea.hbm %s933_s3, 1024 }
  0x26   :  { %p689_p2 = scmp.ne.s32.totalorder %s933_s3, %s688_s12  ;;  %p692_p3 = scmp.lt.u32.totalorder %s688_s12, %s933_s3 }
  0x28   :  { %p694_p4 = pnand %p692_p3, %p689_p2 }
  0x2a   :  { %697 = shalt.err (!%p694_p4)
}
  0x2b   :  { %s698_s19 = scalar_lea.vmem %s47_s22, 1024  ;;  %p703_p6 = scmp.lt.s32.totalorder %s47_s22, %s47_s22 }
  0x2c   :  { %p699_p5 = scmp.ne.s32.totalorder %s47_s22, %s698_s19  ;;  %p704_p7 = scmp.lt.s32.totalorder %s698_s19, %s698_s19 }
  0x2e   :  { %p705_p8 = por %p704_p7, %p703_p6 }
  0x30   :  { %p706_p9 = pnand %p705_p8, %p699_p5 }
  0x32   :  { %709 = shalt.err (!%p706_p9)
}
  0x33   :  { %52 = dma.hbm_to_vmem [thread:$0]  %s933_s3, 1024, %s47_s22, [#allocation6], %s763_s15, %s763_s15, %s764_s16  }
  0x34   :  { %s767_s21 = smov [#allocation8]   ;;  %s710_s26 = scalar_lea.hbm %s935_s5, 1024 }
  0x35   :  { %s60_s23 = sshll.u32 %s767_s21, 4  ;;  %p711_p10 = scmp.ne.s32.totalorder %s935_s5, %s710_s26  ;;  %s61_s23 = int_to_ptr.vmem [resolvable:$true] %s60_s23 }
  0x36   :  { %p714_p11 = scmp.lt.u32.totalorder %s710_s26, %s935_s5 }
  0x38   :  { %p716_p12 = pnand %p714_p11, %p711_p10 }
  0x3a   :  { %719 = shalt.err (!%p716_p12)
}
  0x3b   :  { %s720_s28 = scalar_lea.vmem %s61_s23, 1024  ;;  %p725_p0 = scmp.lt.s32.totalorder %s61_s23, %s61_s23 }
  0x3c   :  { %p721_p13 = scmp.ne.s32.totalorder %s61_s23, %s720_s28  ;;  %p726_p1 = scmp.lt.s32.totalorder %s720_s28, %s720_s28 }
  0x3e   :  { %p727_p2 = por %p726_p1, %p725_p0 }
  0x40   :  { %p728_p3 = pnand %p727_p2, %p721_p13 }
  0x42   :  { %731 = shalt.err (!%p728_p3)
}
  0x43   :  { %66 = dma.hbm_to_vmem [thread:$0]  %s935_s5, 1024, %s61_s23, [#allocation9], %s763_s15, %s763_s15, %s764_s16  }
  0x44   :  { %754 = dma.done.wait [#allocation3], 128  }
  0x45   :  { %755 = vsyncadd [#allocation3], 4294967168 }
  0x46   :  { %756 = dma.done.wait [#allocation6], 2048  }
  0x47   :  { %757 = vsyncadd [#allocation6], 4294965248 }
  0x48   :  { %758 = dma.done.wait [#allocation9], 1024  }
  0x49   :  { %759 = vsyncadd [#allocation9], 4294966272  ;;  %v768_v0 = vmov 0.0   ;;  %vm769_vm0 = vmmov 0   ;;  %v620_v1 = vld [vmem:[#allocation5] sm:$0xff]   ;;  %v621_v2 = vld [vmem:[#allocation5 + $0x8] sm:$0xff]  }
  0x4a   :  { %545 = vmatprep.subr.bf16.mxu0 %v768_v0  ;;  %561 = vmatprep.mubr.msk.bf16.mxu0 %vm769_vm0, %v768_v0  ;;  %v622_v3 = vld [vmem:[#allocation5 + $0x10] sm:$0xff]   ;;  %v628_v4 = vld [vmem:[#allocation7] sm:$0xff]   ;;  %v623_v5 = vld [vmem:[#allocation5 + $0x18] sm:$0xff]   ;;  %s770_s12 = smov [#allocation10]   ;;  %vm470_vm1 = vcmask 57344  }
  0x4b   :  { %565 = vmatprep.subr.bf16.mxu1 %v768_v0  ;;  %581 = vmatprep.mubr.msk.bf16.mxu1 %vm769_vm0, %v768_v0  ;;  %v629_v6 = vld [vmem:[#allocation7 + $0x8] sm:$0xff]   ;;  %v624_v7 = vld [vmem:[#allocation5 + $0x20] sm:$0xff]   ;;  %v630_v8 = vld [vmem:[#allocation7 + $0x10] sm:$0xff]   ;;  %s478_s13 = sshll.u32 %s770_s12, 4  ;;  %s479_s13 = int_to_ptr.vmem [resolvable:$true] %s478_s13 }
  0x4c   :  { %546 = vmatpush3.bf16.msra.mxu0 %v620_v1  ;;  %566 = vmatpush3.bf16.msra.mxu1 %v628_v4  ;;  %v625_v9 = vld [vmem:[#allocation5 + $0x28] sm:$0xff]   ;;  %v631_v10 = vld [vmem:[#allocation7 + $0x18] sm:$0xff]   ;;  %v626_v11 = vld [vmem:[#allocation5 + $0x30] sm:$0xff]   ;;  %s736_s14 = scalar_lea.vmem %s479_s13, 32  ;;  %p737_p5 = scmp.lt.s32.totalorder %s479_s13, %s479_s13 }
  0x4d   :  { %547 = vmatprep.subr.bf16.mxu0 %v768_v0  ;;  %567 = vmatprep.subr.bf16.mxu1 %v768_v0  ;;  %v632_v12 = vld [vmem:[#allocation7 + $0x20] sm:$0xff]   ;;  %v627_v13 = vld [vmem:[#allocation5 + $0x38] sm:$0xff]   ;;  %v633_v15 = vld [vmem:[#allocation7 + $0x28] sm:$0xff]  }
  0x4e   :  { %v85_v14 = vld [vmem:[#allocation2] sm:$0xff]  ;;  %v634_v17 = vld [vmem:[#allocation7 + $0x30] sm:$0xff]   ;;  %v636_v19 = vld [vmem:[#allocation8] sm:$0xff]  }
  0x4f   :  { %v86_v16 = vpack.c.bf16 %v85_v14, %v85_v14  ;;  %v635_v18 = vld [vmem:[#allocation7 + $0x38] sm:$0xff]   ;;  %v637_v20 = vld [vmem:[#allocation8 + $0x8] sm:$0xff]   ;;  %v638_v21 = vld [vmem:[#allocation8 + $0x10] sm:$0xff]  }
  0x50   :  { %548 = vmatpush3.bf16.msra.mxu0 %v621_v2  ;;  %568 = vmatpush3.bf16.msra.mxu1 %v629_v6  ;;  %v639_v22 = vld [vmem:[#allocation8 + $0x18] sm:$0xff]   ;;  %v640_v23 = vld [vmem:[#allocation8 + $0x20] sm:$0xff]   ;;  %v641_v24 = vld [vmem:[#allocation8 + $0x28] sm:$0xff]  }
  0x51   :  { %549 = vmatprep.subr.bf16.mxu0 %v768_v0  ;;  %569 = vmatprep.subr.bf16.mxu1 %v768_v0  ;;  %v489_v25 = vld [vmem:[%s932_s2] ss:$0 sm:$0xff]  ;;  %v642_v34 = vld [vmem:[#allocation8 + $0x30] sm:$0xff]  }
  0x52   :  { %v643_v35 = vld [vmem:[#allocation8 + $0x38] sm:$0xff]  }
  0x53   :  { %v498_v36 = vld [vmem:[%s934_s4] ss:$0 sm:$0xff] }
  0x54   :  { %550 = vmatpush3.bf16.msra.mxu0 %v622_v3  ;;  %570 = vmatpush3.bf16.msra.mxu1 %v630_v8  ;;  %v507_v45 = vld [vmem:[%s936_s6] ss:$0 sm:$0xff]  ;;  %s732_s6 = scalar_lea.vmem %s479_s13, 16 }
  0x55   :  { %551 = vmatprep.subr.bf16.mxu0 %v768_v0  ;;  %571 = vmatprep.subr.bf16.mxu1 %v768_v0  ;;  %v429_v54 = vld [vmem:[%s937_s7] sm:$0xf]  ;;  %p733_p4 = scmp.ne.s32.totalorder %s479_s13, %s732_s6  ;;  %p738_p6 = scmp.lt.s32.totalorder %s736_s14, %s732_s6 }
  0x57   :  { %p739_p7 = por %p738_p6, %p737_p5 }
  0x58   :  { %552 = vmatpush3.bf16.msra.mxu0 %v623_v5  ;;  %572 = vmatpush3.bf16.msra.mxu1 %v631_v10 }
  0x59   :  { %553 = vmatprep.subr.bf16.mxu0 %v768_v0  ;;  %573 = vmatprep.subr.bf16.mxu1 %v768_v0  ;;  %p740_p8 = pnand %p739_p7, %p733_p4 }
  0x5c   :  { %554 = vmatpush3.bf16.msra.mxu0 %v624_v7  ;;  %574 = vmatpush3.bf16.msra.mxu1 %v632_v12 }
  0x5d   :  { %555 = vmatprep.subr.bf16.mxu0 %v768_v0  ;;  %575 = vmatprep.subr.bf16.mxu1 %v768_v0 }
  0x60   :  { %556 = vmatpush3.bf16.msra.mxu0 %v625_v9  ;;  %576 = vmatpush3.bf16.msra.mxu1 %v633_v15 }
  0x61   :  { %557 = vmatprep.subr.bf16.mxu0 %v768_v0  ;;  %577 = vmatprep.subr.bf16.mxu1 %v768_v0 }
  0x64   :  { %558 = vmatpush3.bf16.msra.mxu0 %v626_v11  ;;  %578 = vmatpush3.bf16.msra.mxu1 %v634_v17 }
  0x65   :  { %559 = vmatprep.subr.bf16.mxu0 %v768_v0  ;;  %579 = vmatprep.subr.bf16.mxu1 %v768_v0 }
  0x68   :  { %560 = vmatpush3.bf16.msra.mxu0 %v627_v13  ;;  %580 = vmatpush3.bf16.msra.mxu1 %v635_v18 }
  0x69   :  { %585 = vmatprep.subr.bf16.mxu0 %v768_v0  ;;  %605 = vmatprep.subr.bf16.mxu1 %v768_v0 }
  0x6b   :  { %562 = vmatmul.mubr.bf16.vlgmr.msra.gmra.mrb[0].mxu0 %v86_v16 }
  0x6c   :  { %601 = vmatprep.mubr.msk.bf16.mxu0 %vm769_vm0, %v768_v0  ;;  %586 = vmatpush3.bf16.msra.mxu0 %v636_v19 }
  0x6d   :  { %587 = vmatprep.subr.bf16.mxu0 %v768_v0 }
  0x70   :  { %588 = vmatpush3.bf16.msra.mxu0 %v637_v20 }
  0x71   :  { %589 = vmatprep.subr.bf16.mxu0 %v768_v0 }
  0x74   :  { %590 = vmatpush3.bf16.msra.mxu0 %v638_v21 }
  0x75   :  { %591 = vmatprep.subr.bf16.mxu0 %v768_v0 }
  0x78   :  { %592 = vmatpush3.bf16.msra.mxu0 %v639_v22 }
  0x79   :  { %593 = vmatprep.subr.bf16.mxu0 %v768_v0 }
  0x7c   :  { %594 = vmatpush3.bf16.msra.mxu0 %v640_v23 }
  0x7d   :  { %595 = vmatprep.subr.bf16.mxu0 %v768_v0 }
  0x80   :  { %596 = vmatpush3.bf16.msra.mxu0 %v641_v24 }
  0x81   :  { %597 = vmatprep.subr.bf16.mxu0 %v768_v0 }
  0x84   :  { %598 = vmatpush3.bf16.msra.mxu0 %v642_v34 }
  0x85   :  { %599 = vmatprep.subr.bf16.mxu0 %v768_v0 }
  0x88   :  { %600 = vmatpush3.bf16.msra.mxu0 %v643_v35 }
 0x13e   :  { %v192_v26 = vpop.f32.mrb[0].mxu0 }
 0x13f   :  { %v193_v27 = vadd.f32 %v489_v25, %v192_v26  ;;  %v563_v28 = vpop.f32.mrb[1].mxu0 }
 0x140   :  { %v195_v29 = vpop.f32.mrb[2].mxu0 }
 0x141   :  { %v198_v30 = vpack.c.bf16 %v193_v27, %v193_v27  ;;  %v564_v31 = vpop.f32.mrb[3].mxu0 }
 0x143   :  { %v199_v32 = vmul.bf16 1045249613, %v198_v30 }
 0x145   :  { %v200_v33 = vmax.bf16 %v199_v32, %v198_v30 }
 0x147   :  { %582 = vmatmul.mubr.bf16.vlgmr.msra.gmra.mrb[0].mxu1 %v200_v33 }
 0x148   :  { %607 = vmatprep.mubr.msk.bf16.mxu1 %vm769_vm0, %v768_v0 }
 0x21a   :  { %v306_v37 = vpop.f32.mrb[0].mxu1 }
 0x21b   :  { %v307_v38 = vadd.f32 %v498_v36, %v306_v37  ;;  %v583_v39 = vpop.f32.mrb[1].mxu1 }
 0x21c   :  { %v309_v40 = vpop.f32.mrb[2].mxu1 }
 0x21d   :  { %v312_v41 = vpack.c.bf16 %v307_v38, %v307_v38  ;;  %v584_v42 = vpop.f32.mrb[3].mxu1 }
 0x21f   :  { %v313_v43 = vmul.bf16 1045249613, %v312_v41 }
 0x221   :  { %v314_v44 = vmax.bf16 %v313_v43, %v312_v41 }
 0x223   :  { %602 = vmatmul.mubr.bf16.vlgmr.msra.gmra.mrb[4].mxu0 %v314_v44 }
 0x2f6   :  { %v420_v46 = vpop.f32.mrb[4].mxu0 }
 0x2f7   :  { %v421_v47 = vadd.f32 %v507_v45, %v420_v46  ;;  %v603_v48 = vpop.f32.mrb[5].mxu0 }
 0x2f8   :  { %v423_v49 = vpop.f32.mrb[6].mxu0 }
 0x2f9   :  { %v426_v50 = vpack.c.bf16 %v421_v47, %v421_v47  ;;  %v604_v51 = vpop.f32.mrb[7].mxu0 }
 0x2fb   :  { %v427_v52 = vmul.bf16 1045249613, %v426_v50 }
 0x2fd   :  { %v428_v53 = vmax.bf16 %v427_v52, %v426_v50 }
 0x2ff   :  { %606 = vmatpush3.bf16.xpose.msra.mxu1 %v428_v53 }
 0x306   :  { %608 = vmatmul.mubr.bf16.vlgmr.msra.gmra.mrb[4].mxu1 %v429_v54 }
 0x3d9   :  { %v464_v55 = vpop.f32.mrb[4].mxu1 }
 0x3da   :  { %v609_v56 = vpop.f32.mrb[5].mxu1  ;;  %471 = vst.msk [vmem:[#allocation10] sm:$0x1] %vm470_vm1, %v464_v55 }
 0x3db   :  { %v467_v57 = vpop.f32.mrb[6].mxu1 }
 0x3dc   :  { %743 = shalt.err (!%p740_p8)
}
 0x3dd   :  { %s744_s7 = scalar_lea.hbm %s938_s8, 16 }
 0x3de   :  { %p745_p9 = scmp.ne.s32.totalorder %s938_s8, %s744_s7  ;;  %p748_p10 = scmp.lt.u32.totalorder %s744_s7, %s938_s8 }
 0x3e0   :  { %p750_p11 = pnand %p748_p10, %p745_p9 }
 0x3e2   :  { %753 = shalt.err (!%p750_p11)
}
 0x3e3   :  { %481 = dma.vmem_to_hbm [thread:$0]  %s479_s13, 16, %s938_s8, [#allocation4]   ;;  %v610_v58 = vpop.f32.mrb[7].mxu1 }
 0x3e4   :  { %760 = dma.done.wait [#allocation4], 16  }
 0x3e5   :  { %761 = vsyncadd [#allocation4], 4294967280 }
 0x3e6   :  { %485 = vsyncpa [#allocation3], 1 }
 0x3e7   :  { %486 = vsyncpa [#allocation6], 1 }
 0x3e8   :  { %487 = vsyncpa [#allocation9], 1 }
 0x3e9   :  { %488 = vsyncpa [#allocation4], 1 }

</bundles_post_ra>
